<compile_context>
chip_gen: v6e
topology: v6e:2x2x1
jax: 0.10.0
libtpu: 0.0.40
codegen_flags: <defaults>
</compile_context>

<pallas_src>
import functools

import jax
import jax.numpy as jnp
from jax import lax
from jax.experimental import pallas as pl
from jax.experimental.pallas import tpu as pltpu


# ----------------------------------------------------------------------------
# Small helpers
# ----------------------------------------------------------------------------
def _largest_divisor_leq(n, target):
    target = max(1, min(n, target))
    best = 1
    for d in range(1, n + 1):
        if n % d == 0 and d <= target:
            best = d
    return best


def fold_bn(w, gamma, beta, mean, var, eps=1e-5):
    """Fold eval-mode BatchNorm into a conv weight (..., Cout) and bias (Cout,)."""
    scale = gamma / jnp.sqrt(var + eps)
    return w * scale, beta - mean * scale


# ----------------------------------------------------------------------------
# Kernel 1: global-average-pool branch -> its additive contribution to the
# final 1x1 conv:  contrib[n] = relu(BN_p(mean_hw(x[n]) @ Wp)) @ Wf_pool
# Grid: (N, HW//chunk).  The chunk axis is an 'arbitrary' reduction with a
# VMEM running-sum accumulator; the two tiny matmuls run once at the last
# chunk.  This avoids loading a whole image block into VMEM.
# ----------------------------------------------------------------------------
def _pool_contrib_kernel(x_ref, wp_ref, bp_ref, wfp_ref, o_ref, sum_ref, *, hw):
    c = pl.program_id(1)

    @pl.when(c == 0)
    def _():
        sum_ref[...] = jnp.zeros_like(sum_ref)

    sum_ref[...] += jnp.sum(x_ref[...].astype(jnp.float32), axis=0,
                            keepdims=True)

    @pl.when(c == pl.num_programs(1) - 1)
    def _():
        mean = sum_ref[...] * (1.0 / hw)                       # (1, Cin)
        z = jnp.dot(mean, wp_ref[...], preferred_element_type=jnp.float32)
        z = jnp.maximum(z + bp_ref[...], 0.0)                  # (1, Cout)
        o_ref[...] = jnp.dot(
            z, wfp_ref[...], preferred_element_type=jnp.float32
        ).astype(o_ref.dtype)


def pool_branch_contrib(x_nhwc, wp, bp, wf_pool):
    """Returns (N, 1, Cf) pool-branch contribution to the final-conv accumulator."""
    N, H, W, Cin = x_nhwc.shape
    HW = H * W
    Cout = wp.shape[1]
    Cf = wf_pool.shape[1]
    chunk = _largest_divisor_leq(HW, 2048)
    x_flat = x_nhwc.reshape(N, HW, Cin)
    return pl.pallas_call(
        functools.partial(_pool_contrib_kernel, hw=float(HW)),
        out_shape=jax.ShapeDtypeStruct((N, 1, Cf), jnp.float32),
        grid=(N, HW // chunk),
        in_specs=[
            pl.BlockSpec((None, chunk, Cin), lambda n, c: (n, c, 0)),
            pl.BlockSpec((Cin, Cout), lambda n, c: (0, 0)),
            pl.BlockSpec((1, Cout), lambda n, c: (0, 0)),
            pl.BlockSpec((Cout, Cf), lambda n, c: (0, 0)),
        ],
        out_specs=pl.BlockSpec((None, 1, Cf), lambda n, c: (n, 0, 0)),
        scratch_shapes=[pltpu.VMEM((1, Cin), jnp.float32)],
        compiler_params=pltpu.CompilerParams(
            dimension_semantics=("parallel", "arbitrary"),
            vmem_limit_bytes=48 * 1024 * 1024),
    )(x_flat.astype(jnp.float32), wp.astype(jnp.float32),
      bp.reshape(1, Cout).astype(jnp.float32), wf_pool.astype(jnp.float32))


# ----------------------------------------------------------------------------
# Kernel 2: fully fused ASPP tile kernel.
# Per grid step (batch n, row-block rb):
#   - manual DMA of the halo'd padded NHWC row window into a VMEM scratch
#   - 1x1 branch + all dilated-3x3 branches (9 shifted-slice matmuls each,
#     folded BN bias, ReLU), each immediately multiplied by its slice of the
#     final 1x1 weight and accumulated
#   - add the per-batch pool-branch contribution and the final folded-BN bias,
#     ReLU, write one lane-contiguous (TH, W, Cf) output tile.
# ----------------------------------------------------------------------------
def _aspp_fused_kernel(x_hbm, wb_ref, bb_ref, wf_ref, bf_ref, pc_ref, o_ref,
                       xtile, *, rates, dmax, th, w, cin, cout, cf):
    n = pl.program_id(0)
    rb = pl.program_id(1)
    th2 = th + 2 * dmax

    # Manual DMA: halo'd row window of the padded input (HBM) -> VMEM scratch.
    # TODO(synk): double-buffer this copy across row blocks to hide DMA latency.
    pltpu.sync_copy(x_hbm.at[n, pl.ds(rb * th, th2), :, :], xtile)

    m = th * w

    def tap(rs, cs):
        # Static slice of the resident halo tile, flattened to a (M, Cin) matmul LHS.
        return xtile[rs:rs + th, cs:cs + w, :].reshape(m, cin)

    # --- branch 0: 1x1 conv (+ folded BN) + ReLU, folded into the final 1x1 ---
    f0 = jnp.dot(tap(dmax, dmax), wb_ref[0],
                 preferred_element_type=jnp.float32)
    f0 = jnp.maximum(f0 + bb_ref[0], 0.0)
    facc = jnp.dot(f0, wf_ref[0:cout, :], preferred_element_type=jnp.float32)

    # --- atrous 3x3 branches: 9 accumulated matmuls over shifted slices ------
    for r, d in enumerate(rates):
        acc = jnp.zeros((m, cout), jnp.float32) + bb_ref[r + 1]
        for kh in range(3):
            for kw in range(3):
                xs = tap(dmax - d + kh * d, dmax - d + kw * d)
                acc = acc + jnp.dot(xs, wb_ref[1 + r * 9 + kh * 3 + kw],
                                    preferred_element_type=jnp.float32)
        fb = jnp.maximum(acc, 0.0)
        facc = facc + jnp.dot(fb, wf_ref[(r + 1) * cout:(r + 2) * cout, :],
                              preferred_element_type=jnp.float32)

    # --- pool-branch contribution (per-batch constant) + final BN bias + ReLU -
    facc = facc + pc_ref[...] + bf_ref[...]
    out = jnp.maximum(facc, 0.0)
    o_ref[...] = out.reshape(th, w, cf).astype(o_ref.dtype)


# ----------------------------------------------------------------------------
# ASPP forward (Pallas)
# ----------------------------------------------------------------------------
def aspp_forward(x_nchw, params, atrous_rates, out_channels):
    x = jnp.transpose(x_nchw, (0, 2, 3, 1)).astype(jnp.float32)   # NHWC
    N, H, W, Cin = x.shape
    rates = tuple(int(r) for r in atrous_rates)
    R = len(rates)
    Cout = out_channels
    Cf = out_channels
    dmax = max(rates) if rates else 0

    # --- fold eval-mode BatchNorm into every conv's weight/bias ---
    w0, b0 = fold_bn(params["w0"], *params["bn0"])                 # (Cin, Cout)
    wa_taps, ba_list = [], []
    for w_hwio, bn in zip(params["wa"], params["bna"]):
        wfold, bfold = fold_bn(w_hwio, *bn)                        # (3,3,Cin,Cout)
        wa_taps.append(wfold.reshape(9, Cin, Cout))                # (kh*3+kw,...)
        ba_list.append(bfold)
    wp, bp = fold_bn(params["wp"], *params["bnp"])                 # (Cin, Cout)
    wf, bf = fold_bn(params["wf"], *params["bnf"])                 # ((R+2)Cout, Cf)

    wb = jnp.concatenate([w0.reshape(1, Cin, Cout)] + wa_taps, axis=0)
    bb = jnp.stack([b0] + ba_list, axis=0).reshape(R + 1, 1, Cout)
    wf_pool = wf[(R + 1) * Cout:(R + 2) * Cout, :]                 # (Cout, Cf)

    # --- pool branch contribution (small fused kernel) ---
    pool_contrib = pool_branch_contrib(x, wp, bp, wf_pool)         # (N, 1, Cf)

    # --- main fused kernel: grid over (batch, row blocks) ---
    # M tile = TH*W rows of the matmuls (target ~1024 rows per tile).
    TH = _largest_divisor_leq(H, max(1, 1024 // W))
    Wp = W + 2 * dmax
    x_pad = jnp.pad(x, ((0, 0), (dmax, dmax), (dmax, dmax), (0, 0)))

    kernel = functools.partial(
        _aspp_fused_kernel, rates=rates, dmax=dmax, th=TH, w=W,
        cin=Cin, cout=Cout, cf=Cf)

    # NOTE: with Cout=32 (test size) the output lane width is <128 (masked
    # stores); real ASPP (Cout=256) is lane-dense.
    out_nhwc = pl.pallas_call(
        kernel,
        out_shape=jax.ShapeDtypeStruct((N, H, W, Cf), jnp.float32),
        grid=(N, H // TH),
        in_specs=[
            pl.BlockSpec(memory_space=pl.ANY),                        # x_pad (HBM)
            pl.BlockSpec((1 + 9 * R, Cin, Cout), lambda n, rb: (0, 0, 0)),
            pl.BlockSpec((R + 1, 1, Cout), lambda n, rb: (0, 0, 0)),
            pl.BlockSpec(((R + 2) * Cout, Cf), lambda n, rb: (0, 0)),
            pl.BlockSpec((1, Cf), lambda n, rb: (0, 0)),
            pl.BlockSpec((None, 1, Cf), lambda n, rb: (n, 0, 0)),     # pool contrib
        ],
        out_specs=pl.BlockSpec((None, TH, W, Cf), lambda n, rb: (n, rb, 0, 0)),
        scratch_shapes=[pltpu.VMEM((TH + 2 * dmax, Wp, Cin), jnp.float32)],
        compiler_params=pltpu.CompilerParams(
            dimension_semantics=("parallel", "parallel"),
            vmem_limit_bytes=48 * 1024 * 1024),
    )(x_pad, wb.astype(jnp.float32), bb.astype(jnp.float32),
      wf.astype(jnp.float32), bf.reshape(1, Cf).astype(jnp.float32),
      pool_contrib)

    # Dropout(0.5) in eval mode = identity.
    return jnp.transpose(out_nhwc, (0, 3, 1, 2))


# ----------------------------------------------------------------------------
# Pure-JAX reference (lax convs) for validation
# ----------------------------------------------------------------------------
def aspp_reference(x_nchw, params, atrous_rates, out_channels):
    x = jnp.transpose(x_nchw, (0, 2, 3, 1)).astype(jnp.float32)
    N, H, W, Cin = x.shape
    dn = ("NHWC", "HWIO", "NHWC")

    def bn_relu(z, g, b, m, v, eps=1e-5):
        return jnp.maximum(g * (z - m) / jnp.sqrt(v + eps) + b, 0.0)

    feats = []
    z = lax.conv_general_dilated(
        x, params["w0"].reshape(1, 1, Cin, out_channels), (1, 1),
        [(0, 0), (0, 0)], dimension_numbers=dn)
    feats.append(bn_relu(z, *params["bn0"]))

    for d, w_hwio, bn in zip(atrous_rates, params["wa"], params["bna"]):
        z = lax.conv_general_dilated(
            x, w_hwio, (1, 1), [(d, d), (d, d)], rhs_dilation=(d, d),
            dimension_numbers=dn)
        feats.append(bn_relu(z, *bn))

    pooled = jnp.mean(x, axis=(1, 2), keepdims=True)
    z = lax.conv_general_dilated(
        pooled, params["wp"].reshape(1, 1, Cin, out_channels), (1, 1),
        [(0, 0), (0, 0)], dimension_numbers=dn)
    pf = bn_relu(z, *params["bnp"])
    feats.append(jnp.broadcast_to(pf, (N, H, W, out_channels)))

    cat = jnp.concatenate(feats, axis=-1)
    z = lax.conv_general_dilated(
        cat, params["wf"].reshape(1, 1, cat.shape[-1], out_channels), (1, 1),
        [(0, 0), (0, 0)], dimension_numbers=dn)
    out = bn_relu(z, *params["bnf"])
    return jnp.transpose(out, (0, 3, 1, 2))


# ----------------------------------------------------------------------------
# Deterministic parameter init (synthetic; mirrors the nn.Module shapes)
# ----------------------------------------------------------------------------
def init_params(key, in_channels, atrous_rates, out_channels):
    n_branches = 1 + len(atrous_rates) + 1

    def bn_init(k, c):
        k1, k2, k3, k4 = jax.random.split(k, 4)
        gamma = 1.0 + 0.1 * jax.random.normal(k1, (c,), jnp.float32)
        beta = 0.1 * jax.random.normal(k2, (c,), jnp.float32)
        mean = 0.1 * jax.random.normal(k3, (c,), jnp.float32)
        var = jnp.abs(1.0 + 0.1 * jax.random.normal(k4, (c,), jnp.float32))
        return gamma, beta, mean, var

    keys = jax.random.split(key, 4 + 2 * len(atrous_rates) + 4)
    ki = iter(keys)
    params = {}
    params["w0"] = 0.1 * jax.random.normal(next(ki), (in_channels, out_channels))
    params["bn0"] = bn_init(next(ki), out_channels)
    params["wa"], params["bna"] = [], []
    for _ in atrous_rates:
        params["wa"].append(
            0.1 * jax.random.normal(next(ki), (3, 3, in_channels, out_channels)))
        params["bna"].append(bn_init(next(ki), out_channels))
    params["wp"] = 0.1 * jax.random.normal(next(ki), (in_channels, out_channels))
    params["bnp"] = bn_init(next(ki), out_channels)
    params["wf"] = 0.1 * jax.random.normal(
        next(ki), (n_branches * out_channels, out_channels))
    params["bnf"] = bn_init(next(ki), out_channels)
    return params


# ----------------------------------------------------------------------------
if __name__ == "__main__":
    batch, in_channels, H, W = 2, 4, 16, 16
    atrous_rates = [1, 2]
    out_channels = 32

    key = jax.random.PRNGKey(0)
    kx, kp = jax.random.split(key)
    x = jax.random.normal(kx, (batch, in_channels, H, W), jnp.float32)
    params = init_params(kp, in_channels, atrous_rates, out_channels)

    out = aspp_forward(x, params, atrous_rates, out_channels)
    out = jax.block_until_ready(out)

    assert out.shape == (batch, out_channels, H, W), out.shape

    ref = jax.block_until_ready(
        aspp_reference(x, params, atrous_rates, out_channels))
    assert jnp.allclose(out, ref, rtol=1e-4, atol=1e-4), (
        float(jnp.max(jnp.abs(out - ref))))

    print("KERNEL_OK")
</pallas_src>

<mosaic_0001>
module attributes {stable_mosaic.version = 11 : i64} {
  func.func @_pool_contrib_kernel(%arg0: i32, %arg1: i32, %arg2: memref<1x256x4xf32, #tpu.memory_space<vmem>>, %arg3: memref<4x32xf32, #tpu.memory_space<vmem>>, %arg4: memref<1x32xf32, #tpu.memory_space<vmem>>, %arg5: memref<32x32xf32, #tpu.memory_space<vmem>>, %arg6: memref<1x1x32xf32, #tpu.memory_space<vmem>>, %arg7: memref<1x4xf32, #tpu.memory_space<vmem>>) attributes {dimension_semantics = [#tpu.dimension_semantics<parallel>, #tpu.dimension_semantics<arbitrary>], iteration_bounds = array<i64: 2, 1>, scalar_prefetch = 0 : i64, scratch_operands = 1 : i64, tpu.core_type = #tpu.core_type<tc>, window_params = [{transform_indices = @transform_0, window_bounds = array<i64: 1, 256, 4>}, {pipeline_mode = #tpu.pipeline_mode<synchronous>, transform_indices = @transform_1, window_bounds = array<i64: 4, 32>}, {pipeline_mode = #tpu.pipeline_mode<synchronous>, transform_indices = @transform_2, window_bounds = array<i64: 1, 32>}, {pipeline_mode = #tpu.pipeline_mode<synchronous>, transform_indices = @transform_3, window_bounds = array<i64: 32, 32>}, {transform_indices = @transform_4, window_bounds = array<i64: 1, 1, 32>}]} {
    %c0_i32 = arith.constant 0 : i32
    %0 = arith.cmpi eq, %arg1, %c0_i32 : i32
    %1 = arith.extui %0 : i1 to i32
    %c0_i32_0 = arith.constant 0 : i32
    %2 = arith.cmpi ne, %1, %c0_i32_0 : i32
    scf.if %2 {
      %cst_9 = arith.constant 0.000000e+00 : f32
      %13 = vector.broadcast %cst_9 : f32 to vector<1x4xf32>
      %c0_10 = arith.constant 0 : index
      %c0_11 = arith.constant 0 : index
      %14 = vector.load %arg7[%c0_10, %c0_11] : memref<1x4xf32, #tpu.memory_space<vmem>>, vector<1x4xf32>
      tpu.vector_store %arg7[%c0_10, %c0_11], %13 {strides = array<i32>} : memref<1x4xf32, #tpu.memory_space<vmem>>, vector<1x4xf32>,
    } else {
    }
    %c0 = arith.constant 0 : index
    %c0_1 = arith.constant 0 : index
    %3 = vector.load %arg7[%c0, %c0_1] : memref<1x4xf32, #tpu.memory_space<vmem>>, vector<1x4xf32>
    %c0_2 = arith.constant 0 : index
    %c0_3 = arith.constant 0 : index
    %c0_4 = arith.constant 0 : index
    %4 = vector.load %arg2[%c0_2, %c0_3, %c0_4] : memref<1x256x4xf32, #tpu.memory_space<vmem>>, vector<1x256x4xf32>
    %5 = vector.shape_cast %4 : vector<1x256x4xf32> to vector<256x4xf32>
    %cst = arith.constant dense<0.000000e+00> : vector<4xf32>
    %6 = vector.multi_reduction <add>, %5, %cst [0] : vector<256x4xf32> to vector<4xf32>
    %7 = vector.shape_cast %6 : vector<4xf32> to vector<1x4xf32>
    %8 = arith.addf %3, %7 : vector<1x4xf32>
    %c0_5 = arith.constant 0 : index
    %c0_6 = arith.constant 0 : index
    %9 = vector.load %arg7[%c0_5, %c0_6] : memref<1x4xf32, #tpu.memory_space<vmem>>, vector<1x4xf32>
    tpu.vector_store %arg7[%c0_5, %c0_6], %8 {strides = array<i32>} : memref<1x4xf32, #tpu.memory_space<vmem>>, vector<1x4xf32>,
    %c0_i32_7 = arith.constant 0 : i32
    %10 = arith.cmpi eq, %arg1, %c0_i32_7 : i32
    %11 = arith.extui %10 : i1 to i32
    %c0_i32_8 = arith.constant 0 : i32
    %12 = arith.cmpi ne, %11, %c0_i32_8 : i32
    scf.if %12 {
      %c0_9 = arith.constant 0 : index
      %c0_10 = arith.constant 0 : index
      %13 = vector.load %arg7[%c0_9, %c0_10] : memref<1x4xf32, #tpu.memory_space<vmem>>, vector<1x4xf32>
      %cst_11 = arith.constant 3.906250e-03 : f32
      %14 = vector.broadcast %cst_11 : f32 to vector<1x4xf32>
      %15 = arith.mulf %13, %14 : vector<1x4xf32>
      %c0_12 = arith.constant 0 : index
      %c0_13 = arith.constant 0 : index
      %16 = vector.load %arg3[%c0_12, %c0_13] : memref<4x32xf32, #tpu.memory_space<vmem>>, vector<4x32xf32>
      %cst_14 = arith.constant dense<0.000000e+00> : vector<1x32xf32>
      %17 = tpu.matmul %15, %16, %cst_14 {dimension_numbers = #tpu.dot_dimension_numbers<[1], [0], [0], [1], [0, 0, 1, 1], [], []>} : vector<1x4xf32>, vector<4x32xf32>, vector<1x32xf32> -> vector<1x32xf32>
      %c0_15 = arith.constant 0 : index
      %c0_16 = arith.constant 0 : index
      %18 = vector.load %arg4[%c0_15, %c0_16] : memref<1x32xf32, #tpu.memory_space<vmem>>, vector<1x32xf32>
      %19 = arith.addf %17, %18 : vector<1x32xf32>
      %cst_17 = arith.constant 0.000000e+00 : f32
      %20 = vector.broadcast %cst_17 : f32 to vector<1x32xf32>
      %21 = arith.maximumf %19, %20 : vector<1x32xf32>
      %c0_18 = arith.constant 0 : index
      %c0_19 = arith.constant 0 : index
      %22 = vector.load %arg5[%c0_18, %c0_19] : memref<32x32xf32, #tpu.memory_space<vmem>>, vector<32x32xf32>
      %cst_20 = arith.constant dense<0.000000e+00> : vector<1x32xf32>
      %23 = tpu.matmul %21, %22, %cst_20 {dimension_numbers = #tpu.dot_dimension_numbers<[1], [0], [0], [1], [0, 0, 1, 1], [], []>} : vector<1x32xf32>, vector<32x32xf32>, vector<1x32xf32> -> vector<1x32xf32>
      %c0_21 = arith.constant 0 : index
      %c0_22 = arith.constant 0 : index
      %c0_23 = arith.constant 0 : index
      %24 = vector.load %arg6[%c0_21, %c0_22, %c0_23] : memref<1x1x32xf32, #tpu.memory_space<vmem>>, vector<1x1x32xf32>
      %25 = vector.shape_cast %24 : vector<1x1x32xf32> to vector<1x32xf32>
      %26 = vector.shape_cast %23 : vector<1x32xf32> to vector<1x1x32xf32>
      tpu.vector_store %arg6[%c0_21, %c0_22, %c0_23], %26 {strides = array<i32>} : memref<1x1x32xf32, #tpu.memory_space<vmem>>, vector<1x1x32xf32>,
    } else {
    }
    return
  }
  func.func @transform_0(%arg0: i32, %arg1: i32) -> (i32, i32, i32) {
    %c0_i32 = arith.constant 0 : i32
    %c0_i32_0 = arith.constant 0 : i32
    return %arg0, %arg1, %c0_i32 : i32, i32, i32
  }
  func.func @transform_1(%arg0: i32, %arg1: i32) -> (i32, i32) {
    %c0_i32 = arith.constant 0 : i32
    %c0_i32_0 = arith.constant 0 : i32
    %c0_i32_1 = arith.constant 0 : i32
    return %c0_i32, %c0_i32_0 : i32, i32
  }
  func.func @transform_2(%arg0: i32, %arg1: i32) -> (i32, i32) {
    %c0_i32 = arith.constant 0 : i32
    %c0_i32_0 = arith.constant 0 : i32
    %c0_i32_1 = arith.constant 0 : i32
    return %c0_i32, %c0_i32_0 : i32, i32
  }
  func.func @transform_3(%arg0: i32, %arg1: i32) -> (i32, i32) {
    %c0_i32 = arith.constant 0 : i32
    %c0_i32_0 = arith.constant 0 : i32
    %c0_i32_1 = arith.constant 0 : i32
    return %c0_i32, %c0_i32_0 : i32, i32
  }
  func.func @transform_4(%arg0: i32, %arg1: i32) -> (i32, i32, i32) {
    %c0_i32 = arith.constant 0 : i32
    %c0_i32_0 = arith.constant 0 : i32
    %c0_i32_1 = arith.constant 0 : i32
    return %arg0, %c0_i32, %c0_i32_0 : i32, i32, i32
  }
}

</mosaic_0001>

<bundles_post_ra>
// kernel: tpu_custom_call.1
= control target key start
LH: loop header
LB: loop body
LE: loop exit
PB: predicated region body
PF: predicated region fallthrough
CT: control target
= control target key end

     0   :  { %9 = vsyncpa [#allocation4], 0  ;;  %s988_s0 = inlined_call_operand.vmem [shape: f32[2,256,4], index: 0, kind: input, shape index: {}]   ;;  %s989_s1 = inlined_call_operand.vmem [shape: f32[4,32], index: 1, kind: input, shape index: {}]   ;;  %s990_s2 = inlined_call_operand.vmem [shape: f32[1,32], index: 2, kind: input, shape index: {}]   ;;  %s991_s3 = inlined_call_operand.vmem [shape: f32[32,32], index: 3, kind: input, shape index: {}]   ;;  %s992_s4 = inlined_call_operand.hbm [shape: f32[2,1,32], index: 4, kind: output, shape index: {}]  }
   0x1   :  { %11 = vsyncpa [#allocation4 + $0x1], 0  ;;  %s782_s15 = smov 0   ;;  %s784_s16 = smov 0  }
   0x2   :  { %s786_s17 = smov 0   ;;  %s788_s18 = smov 0  }
   0x3   :  { %s790_s19 = smov 0   ;;  %s792_s20 = smov 0  }
   0x4 LB: > { %s582_s21 = sadd.s32 4294967295, %s752_s20   ;;  %s583_s22 = sadd.s32 4294967294, %s752_s20   ;;  %s752_s20 = sphi %s792_s20, %s17_s20   ;;  %s748_s19 = sphi %s790_s19, %s999_s19   ;;  %s744_s18 = sphi %s788_s18, %s998_s18   ;;  %s740_s17 = sphi %s786_s17, %s997_s17   ;;  %s736_s16 = sphi %s784_s16, %s996_s16   ;;  %s732_s15 = sphi %s782_s15, %s995_s15  }
   0x5   : > { %s29_s23 = sadd.s32 1, %s748_s19  ;;  %s127_s24 = sadd.s32 1, %s740_s17 }
   0x6   : > { %p31_p0 = scmp.ge.s32.totalorder %s29_s23, 2  ;;  %p137_p1 = scmp.ne.s32.totalorder %s740_s17, %s736_s16 }
   0x7   : > { %p138_p2 = scmp.eq.s32.totalorder %s582_s21, 1  ;;  %p143_p3 = scmp.ne.s32.totalorder %s736_s16, %s732_s15 }
   0x8   : > { %s1001_s23 = smov (%p31_p0, %s29_s23), 0  ;;  %p144_p5 = scmp.eq.s32.totalorder %s583_s22, 1 }
   0x9   : > { %p822_p4 = por %p138_p2, %p137_p1  ;;  %s124_s26 = ssub.s32 %s748_s19, %s1001_s23 }
   0xa   : > { %p586_p6 = scmp.ge.s32.totalorder %s752_s20, 1  ;;  %p125_p7 = scmp.eq.s32.totalorder %s124_s26, 0 }
   0xb   : > { %p829_p8 = por %p144_p5, %p143_p3  ;;  %p184_p9 = scmp.lt.s32.totalorder %s752_s20, 3 }
   0xc   : > { %s835_s28 = scalar_select %p125_p7, %s740_s17, %s127_s24  }
   0xd   : > { %p185_p10 = pnand %p586_p6, %p184_p9 }
   0xe   : > { %p214_p11 = scmp.lt.s32.totalorder (!%p185_p10), %s744_s18, 1  ;;  %s211_s30 = sand.u32 (!%p185_p10), 1, %s736_s16  }
   0xf   : > { %188 = sbr.rel (%p185_p10) target bundleno = 517 (0x205), region = 36  ;;  %s592_s5 = sshll.u32 (!%p185_p10), %s744_s18, 4 }
  0x10   : > { %s212_s6 = scalar_lea.vmem (!%p185_p10), [#allocation3], %s211_s30  ;;  %s942_s10 = scalar_lea.hbm (!%p185_p10), %s992_s4, %s592_s5 }
  0x14   : > { %vm227_vm0 = vcmask 24576   ;;  %v340_v0 = vld [vmem:[%s989_s1] sm:$0xf]  ;;  %v754_v1 = vmov 0.0   ;;  %vm345_vm1 = vcmask 1043456   ;;  %v423_v2 = vld [vmem:[%s991_s3 + $0x18] sm:$0xff] }
  0x15   : > { %228 = vst.msk [vmem:[#allocation2] sm:$0x1] %vm227_vm0, %v754_v1  ;;  %603 = vmatprep.subr.mxu0 %v754_v1  ;;  %608 = vmatprep.subr.mxu1 %v754_v1  ;;  %s215_s7 = scalar_select %p214_p11, %s744_s18, 1  ;;  %vm755_vm2 = vmmov 0   ;;  %vm262_vm3 = vcmask 31744   ;;  %vm424_vm4 = vcmask 261120  }
  0x16   : > { %604 = vmatpush3.msk.msra.mxu0 %vm345_vm1, %v340_v0  ;;  %605 = vmatprep.mubr.msk.f32.mxu0 %vm755_vm2, %v754_v1  ;;  %vm498_vm5 = vcmask 253952   ;;  %s756_s18 = smov [#allocation3]  }
  0x17   : > { %609 = vmatpush3.msra.mxu1 %v423_v2  ;;  %616 = vmatprep.mubr.msk.f32.mxu1 %vm755_vm2, %v754_v1  ;;  %s595_s8 = sshll.u32 %s215_s7, 8  ;;  %s513_s7 = sshll.u32 %s212_s6, 4  ;;  %s944_s7 = int_to_ptr.vmem [resolvable:$true] %s513_s7 }
  0x18   : > { %610 = vmatprep.subr.mxu1 %v754_v1  ;;  %s855_s11 = scalar_lea.vmem %s988_s0, %s595_s8  ;;  %s676_s12 = scalar_lea.vmem %s944_s7, 16 }
  0x19   : > { %v230_v3 = vld [vmem:[%s855_s11] sm:$0xff]  ;;  %v231_v4 = vld [vmem:[%s855_s11 + $0x8] sm:$0xff]  ;;  %v232_v5 = vld [vmem:[%s855_s11 + $0x10] sm:$0xff]  ;;  %p677_p12 = scmp.ne.s32.totalorder %s944_s7, %s676_s12  ;;  %s680_s13 = sshll.u32 %s756_s18, 4  ;;  %s681_s13 = int_to_ptr.vmem [resolvable:$false] %s680_s13 }
  0x1a   : > { %v233_v6 = vld [vmem:[%s855_s11 + $0x18] sm:$0xff]  ;;  %v263_v7 = vsel %vm262_vm3, %v230_v3, 0.0  ;;  %v264_v8 = vsel %vm262_vm3, %v231_v4, 0.0  ;;  %v266_v9 = vsel %vm262_vm3, %v232_v5, 0.0  ;;  %v234_v10 = vld [vmem:[%s855_s11 + $0x20] sm:$0xff]  ;;  %v235_v13 = vld [vmem:[%s855_s11 + $0x28] sm:$0xff]  ;;  %p683_p1 = scmp.lt.s32.totalorder %s944_s7, %s681_s13 }
  0x1b   : > { %v265_v11 = vadd.f32 %v264_v8, %v263_v7  ;;  %v268_v12 = vsel %vm262_vm3, %v233_v6, 0.0  ;;  %v270_v15 = vsel %vm262_vm3, %v234_v10, 0.0  ;;  %v236_v16 = vld [vmem:[%s855_s11 + $0x30] sm:$0xff]  ;;  %v272_v18 = vsel %vm262_vm3, %v235_v13, 0.0  ;;  %v237_v19 = vld [vmem:[%s855_s11 + $0x38] sm:$0xff]  ;;  %v238_v22 = vld [vmem:[%s855_s11 + $0x40] sm:$0xff]  ;;  %p678_p13 = pnand %p677_p12, %p822_p4 }
  0x1c   : > { %v274_v21 = vsel %vm262_vm3, %v236_v16, 0.0  ;;  %v276_v24 = vsel %vm262_vm3, %v237_v19, 0.0  ;;  %v239_v25 = vld [vmem:[%s855_s11 + $0x48] sm:$0xff]  ;;  %v278_v27 = vsel %vm262_vm3, %v238_v22, 0.0  ;;  %v240_v28 = vld [vmem:[%s855_s11 + $0x50] sm:$0xff]  ;;  %v241_v31 = vld [vmem:[%s855_s11 + $0x58] sm:$0xff] }
  0x1d   : > { %v267_v14 = vadd.f32 %v266_v9, %v265_v11  ;;  %v280_v30 = vsel %vm262_vm3, %v239_v25, 0.0  ;;  %v282_v33 = vsel %vm262_vm3, %v240_v28, 0.0  ;;  %v242_v34 = vld [vmem:[%s855_s11 + $0x60] sm:$0xff]  ;;  %v284_v36 = vsel %vm262_vm3, %v241_v31, 0.0  ;;  %v243_v37 = vld [vmem:[%s855_s11 + $0x68] sm:$0xff]  ;;  %v244_v40 = vld [vmem:[%s855_s11 + $0x70] sm:$0xff]  ;;  %p679_p0 = pneg %p678_p13 }
  0x1e   : > { %v286_v39 = vsel %vm262_vm3, %v242_v34, 0.0  ;;  %v288_v42 = vsel %vm262_vm3, %v243_v37, 0.0  ;;  %v245_v43 = vld [vmem:[%s855_s11 + $0x78] sm:$0xff]  ;;  %v290_v45 = vsel %vm262_vm3, %v244_v40, 0.0  ;;  %v246_v46 = vld [vmem:[%s855_s11 + $0x80] sm:$0xff]  ;;  %v247_v49 = vld [vmem:[%s855_s11 + $0x88] sm:$0xff] }
  0x1f   : > { %v269_v17 = vadd.f32 %v268_v12, %v267_v14  ;;  %v292_v48 = vsel %vm262_vm3, %v245_v43, 0.0  ;;  %v294_v51 = vsel %vm262_vm3, %v246_v46, 0.0  ;;  %v248_v52 = vld [vmem:[%s855_s11 + $0x90] sm:$0xff]  ;;  %v296_v54 = vsel %vm262_vm3, %v247_v49, 0.0  ;;  %v249_v55 = vld [vmem:[%s855_s11 + $0x98] sm:$0xff]  ;;  %v250_v58 = vld [vmem:[%s855_s11 + $0xa0] sm:$0xff] }
  0x20   : > { %v298_v57 = vsel %vm262_vm3, %v248_v52, 0.0  ;;  %v300_v60 = vsel %vm262_vm3, %v249_v55, 0.0  ;;  %v251_v61 = vld [vmem:[%s855_s11 + $0xa8] sm:$0xff]  ;;  %v302_v63 = vsel %vm262_vm3, %v250_v58, 0.0  ;;  %v252_v0 = vld [vmem:[%s855_s11 + $0xb0] sm:$0xff]  ;;  %v253_v4 = vld [vmem:[%s855_s11 + $0xb8] sm:$0xff] }
  0x21   : > { %v271_v20 = vadd.f32 %v270_v15, %v269_v17  ;;  %v304_v3 = vsel %vm262_vm3, %v251_v61, 0.0  ;;  %v306_v6 = vsel %vm262_vm3, %v252_v0, 0.0  ;;  %v254_v7 = vld [vmem:[%s855_s11 + $0xc0] sm:$0xff]  ;;  %v308_v9 = vsel %vm262_vm3, %v253_v4, 0.0  ;;  %v255_v10 = vld [vmem:[%s855_s11 + $0xc8] sm:$0xff]  ;;  %v256_v13 = vld [vmem:[%s855_s11 + $0xd0] sm:$0xff] }
  0x22   : > { %v310_v12 = vsel %vm262_vm3, %v254_v7, 0.0  ;;  %v312_v15 = vsel %vm262_vm3, %v255_v10, 0.0  ;;  %v257_v16 = vld [vmem:[%s855_s11 + $0xd8] sm:$0xff]  ;;  %v258_v19 = vld [vmem:[%s855_s11 + $0xe0] sm:$0xff]  ;;  %v259_v22 = vld [vmem:[%s855_s11 + $0xe8] sm:$0xff]  ;;  %s682_s14 = scalar_lea.vmem %s681_s13, 32 }
  0x23   : > { %v273_v23 = vadd.f32 %v272_v18, %v271_v20  ;;  %v314_v18 = vsel %vm262_vm3, %v256_v13, 0.0  ;;  %v260_v25 = vld [vmem:[%s855_s11 + $0xf0] sm:$0xff]  ;;  %v261_v28 = vld [vmem:[%s855_s11 + $0xf8] sm:$0xff]  ;;  %v229_v40 = vld [vmem:[#allocation2] sm:$0x1]  ;;  %s501_s11 = scalar_lea.sflag [#allocation4], %s211_s30  ;;  %p684_p2 = scmp.lt.s32.totalorder %s682_s14, %s676_s12 }
  0x24   : > { %v421_v46 = vld [vmem:[%s991_s3 + $0x8] sm:$0xff] }
  0x25   : > { %v275_v26 = vadd.f32 %v274_v21, %v273_v23  ;;  %v316_v21 = vsel %vm262_vm3, %v257_v16, 0.0  ;;  %p685_p3 = por %p684_p2, %p683_p1 }
  0x27   : > { %v277_v29 = vadd.f32 %v276_v24, %v275_v26  ;;  %v318_v24 = vsel %vm262_vm3, %v258_v19, 0.0  ;;  %p686_p5 = pnand %p685_p3, %p679_p0 }
  0x29   : > { %v279_v32 = vadd.f32 %v278_v27, %v277_v29  ;;  %v320_v27 = vsel %vm262_vm3, %v259_v22, 0.0 }
  0x2b   : > { %v281_v35 = vadd.f32 %v280_v30, %v279_v32  ;;  %v322_v30 = vsel %vm262_vm3, %v260_v25, 0.0  ;;  %v324_v32 = vsel %vm262_vm3, %v261_v28, 0.0 }
  0x2d   : > { %v283_v38 = vadd.f32 %v282_v33, %v281_v35 }
  0x2f   : > { %v285_v41 = vadd.f32 %v284_v36, %v283_v38 }
  0x31   : > { %v287_v44 = vadd.f32 %v286_v39, %v285_v41 }
  0x33   : > { %v289_v47 = vadd.f32 %v288_v42, %v287_v44 }
  0x35   : > { %v291_v50 = vadd.f32 %v290_v45, %v289_v47  ;;  %v422_v45 = vld [vmem:[%s991_s3 + $0x10] sm:$0xff]  ;;  %v420_v47 = vld [vmem:[%s991_s3] sm:$0xff] }
  0x36   : > { %611 = vmatpush3.msra.mxu1 %v422_v45 }
  0x37   : > { %v293_v53 = vadd.f32 %v292_v48, %v291_v50  ;;  %612 = vmatprep.subr.mxu1 %v754_v1  ;;  %v341_v48 = vld [vmem:[%s990_s2] sm:$0x1] }
  0x38   : > { %613 = vmatpush3.msra.mxu1 %v421_v46 }
  0x39   : > { %v295_v56 = vadd.f32 %v294_v51, %v293_v53  ;;  %614 = vmatprep.subr.mxu1 %v754_v1 }
  0x3a   : > { %615 = vmatpush3.msra.mxu1 %v420_v47 }
  0x3b   : > { %v297_v59 = vadd.f32 %v296_v54, %v295_v56 }
  0x3d   : > { %v299_v62 = vadd.f32 %v298_v57, %v297_v59 }
  0x3f   : > { %v301_v2 = vadd.f32 %v300_v60, %v299_v62 }
  0x41   : > { %v303_v5 = vadd.f32 %v302_v63, %v301_v2 }
  0x43   : > { %v305_v8 = vadd.f32 %v304_v3, %v303_v5 }
  0x45   : > { %v307_v11 = vadd.f32 %v306_v6, %v305_v8 }
  0x47   : > { %v309_v14 = vadd.f32 %v308_v9, %v307_v11 }
  0x49   : > { %v311_v17 = vadd.f32 %v310_v12, %v309_v14 }
  0x4b   : > { %v313_v20 = vadd.f32 %v312_v15, %v311_v17 }
  0x4d   : > { %v315_v23 = vadd.f32 %v314_v18, %v313_v20 }
  0x4f   : > { %v317_v26 = vadd.f32 %v316_v21, %v315_v23 }
  0x51   : > { %v319_v29 = vadd.f32 %v318_v24, %v317_v26 }
  0x53   : > { %v321_v31 = vadd.f32 %v320_v27, %v319_v29 }
  0x55   : > { %v323_v33 = vadd.f32 %v322_v30, %v321_v31 }
  0x57   : > { %v325_v34 = vadd.f32 %v324_v32, %v323_v33 }
  0x59   : > { %v326_v35 = vrot.slane %v325_v34, 4 }
  0x5b   : > { %v327_v36 = vadd.f32 %v326_v35, %v325_v34 }
  0x5d   : > { %v328_v37 = vrot.slane %v327_v36, 2 }
  0x5f   : > { %v329_v38 = vadd.f32 %v328_v37, %v327_v36 }
  0x61   : > { %v330_v39 = vrot.slane %v329_v38, 1 }
  0x63   : > { %v331_v41 = vadd.f32 %v330_v39, %v329_v38 }
  0x65   : > { %v332_v42 = vadd.f32 %v331_v41, %v229_v40 }
  0x67   : > { %334 = vst.msk [vmem:[#allocation2] sm:$0x1] %vm227_vm0, %v332_v42 }
  0x6e   : > { %v338_v43 = vld [vmem:[#allocation2] sm:$0x1] }
  0x6f   : > { %v339_v44 = vmul.f32 0.00390625, %v338_v43 }
  0x71   : > { %606 = vmatmul.mubr.msk.f32.vlgmr.msra.gmra.mxu0 %vm262_vm3, %v339_v44 }
 0x131   : > { %v415_v49 = vpop.f32.mrf.mxu0 }
 0x132   : > { %v416_v50 = vadd.f32 %v415_v49, %v341_v48 }
 0x133   : > { %v607_v51 = vpop.f32.mrf.mxu0 }
 0x134   : > { %v419_v52 = vmax.f32 %v416_v50, 0.0 }
 0x136   : > { %617 = vmatmul.mubr.msk.f32.vlgmr.msra.gmra.mxu1 %vm424_vm4, %v419_v52 }
 0x1f6   : > { %v494_v1 = vpop.f32.mrf.mxu1 }
 0x1f7   : > { %499 = vst.msk [vmem:[%s212_s6] sm:$0x1] %vm498_vm5, %v494_v1 }
 0x1f8   : > { %v618_v53 = vpop.f32.mrf.mxu1 }
 0x1f9   : > { %689 = shalt.err (!%p686_p5)
}
 0x1fa   : > { %s690_s21 = scalar_lea.hbm %s942_s10, 16  ;;  %s694_s26 = scalar_lea.hbm %s992_s4, 32 }
 0x1fb   : > { %p691_p6 = scmp.ne.s32.totalorder %s942_s10, %s690_s21  ;;  %p695_p10 = scmp.lt.s32.totalorder %s942_s10, %s992_s4 }
 0x1fc   : > { %p696_p11 = scmp.lt.s32.totalorder %s694_s26, %s690_s21 }
 0x1fd   : > { %p692_p7 = pnand %p691_p6, %p822_p4 }
 0x1fe   : > { %p697_p12 = por %p696_p11, %p695_p10 }
 0x1ff   : > { %p693_p9 = pneg %p692_p7 }
 0x201   : > { %p698_p13 = pnand %p697_p12, %p693_p9 }
 0x203   : > { %701 = shalt.err (!%p698_p13)
}
 0x204   : > { %619 = dma.vmem_to_hbm [thread:$0]  (%p822_p4), %s944_s7, 16, %s942_s10, %s501_s11  }
 0x205 PF: > { %p625_p0 = scmp.ge.s32.totalorder %s752_s20, 2  ;;  %s525_s5 = sand.u32 1, %s732_s15  }
 0x206   : > { %s526_s6 = scalar_lea.sflag [#allocation4], %s525_s5 }
 0x207   : > { %p622_p1 = pnand %p625_p0, %p829_p8 }
 0x209   : > { %p623_p2 = pneg %p622_p1 }
 0x20b   : > { %727 = dma.done.wait (%p623_p2), %s526_s6, 16  }
 0x20c   : > { %729 = vsyncadd (%p623_p2), %s526_s6, 4294967280  ;;  %s17_s20 = sadd.s32 1, %s752_s20   ;;  %s995_s15 = smov %s736_s16 }
 0x20d   : > { %p14_p3 = scmp.ge.s32.totalorder %s17_s20, 4   ;;  %s996_s16 = smov %s740_s17 }
 0x20e   : > { %s997_s17 = smov %s835_s28  ;;  %s998_s18 = smov %s748_s19 }
 0x20f   : > { %s999_s19 = smov %s1001_s23  ;;  %16 = sbr.rel (!%p14_p3) target bundleno = 4 (0x4), region = 79 }
 0x214   :  { %530 = vsyncpa [#allocation4], 1 }
 0x215   :  { %532 = vsyncpa [#allocation4 + $0x1], 1 }

</bundles_post_ra>
